<compile_context>
chip_gen: v7x
topology: tpu7x:2x2x1
jax: 0.10.0
libtpu: 0.0.40
codegen_flags: <defaults>
</compile_context>

<pallas_src>
import jax
import jax.numpy as jnp
from jax import lax
from jax.experimental import pallas as pl
from jax.experimental.pallas import tpu as pltpu


def _stats_net_kernel(x_ref, z_ref, w1x_ref, w1z_ref, b1_ref,
                      w2_ref, b2_ref, w3_ref, o_ref):
    # First Linear + ReLU.  concat(x, z) @ W1 == x @ W1[:Dx] + z @ W1[Dx:].
    h1 = jnp.dot(x_ref[...], w1x_ref[...], preferred_element_type=jnp.float32)
    h1 = h1 + jnp.dot(z_ref[...], w1z_ref[...], preferred_element_type=jnp.float32)
    h1 = jnp.maximum(h1 + b1_ref[...], 0.0)

    # Second Linear + ReLU.
    h2 = jnp.dot(h1, w2_ref[...], preferred_element_type=jnp.float32) + b2_ref[...]
    h2 = jnp.maximum(h2, 0.0)

    # Final Linear(H, 1) computed as (1, H) x (bt, H)^T -> (1, bt) so the output
    # block is lane-dense.  The scalar bias b3 is added in the wrapper.
    o_ref[...] = lax.dot_general(
        w3_ref[...], h2,
        dimension_numbers=(((1,), (1,)), ((), ())),
        preferred_element_type=jnp.float32,
    ).astype(o_ref.dtype)


def statistics_network(x, z, params, *, batch_tile=256):
    """Pallas forward of StatisticsNetwork. x: [B, Dx], z: [B, Dz] -> [B, 1]."""
    w1, b1, w2, b2, w3, b3 = params
    B, Dx = x.shape
    Bz, Dz = z.shape
    assert B == Bz
    H = w1.shape[1]
    assert w1.shape == (Dx + Dz, H)

    batch_tile = min(batch_tile, B)
    assert B % batch_tile == 0, "batch must be divisible by batch_tile"
    assert batch_tile == B or batch_tile % 128 == 0, (
        "batch_tile must be a multiple of 128 (lane-dense output) or equal B")

    # Zero-pad the hidden dim to a multiple of 128 for full lane utilization.
    Hp = max(128, ((H + 127) // 128) * 128)
    pad_h = Hp - H
    if pad_h:
        w1 = jnp.pad(w1, ((0, 0), (0, pad_h)))
        b1 = jnp.pad(b1, ((0, 0), (0, pad_h)))
        w2 = jnp.pad(w2, ((0, pad_h), (0, pad_h)))
        b2 = jnp.pad(b2, ((0, 0), (0, pad_h)))
        w3 = jnp.pad(w3, ((0, pad_h), (0, 0)))

    # Fold the ConcatLayer into a split first-layer matmul.
    w1x = w1[:Dx, :]                  # (Dx, Hp)
    w1z = w1[Dx:, :]                  # (Dz, Hp)
    w3_row = w3.reshape(1, Hp)        # (1, Hp)

    grid = (B // batch_tile,)

    in_specs = [
        pl.BlockSpec((batch_tile, Dx), lambda i: (i, 0)),
        pl.BlockSpec((batch_tile, Dz), lambda i: (i, 0)),
        # Constant index_map -> DMA'd once, resident across the batch grid.
        pl.BlockSpec((Dx, Hp), lambda i: (0, 0)),
        pl.BlockSpec((Dz, Hp), lambda i: (0, 0)),
        pl.BlockSpec((1, Hp), lambda i: (0, 0)),
        pl.BlockSpec((Hp, Hp), lambda i: (0, 0)),
        pl.BlockSpec((1, Hp), lambda i: (0, 0)),
        pl.BlockSpec((1, Hp), lambda i: (0, 0)),
    ]
    # Lane-dense output: one (1, batch_tile) row per grid step.
    out_spec = pl.BlockSpec((1, batch_tile), lambda i: (0, i))

    out_row = pl.pallas_call(
        _stats_net_kernel,
        out_shape=jax.ShapeDtypeStruct((1, B), jnp.float32),
        grid_spec=pltpu.PrefetchScalarGridSpec(
            num_scalar_prefetch=0,
            grid=grid,
            in_specs=in_specs,
            out_specs=out_spec,
        ),
        compiler_params=pltpu.CompilerParams(
            dimension_semantics=("parallel",)),
    )(x, z, w1x, w1z, b1, w2, b2, w3_row)

    # Final scalar bias and reshape back to the module's (B, 1) output.
    return out_row.reshape(B, 1) + b3.reshape(1, 1)


def init_params(key, dx, dz, hidden):
    """Deterministic parameter init (stand-in for the nn.Linear weights)."""
    ks = jax.random.split(key, 6)
    w1 = 0.1 * jax.random.normal(ks[0], (dx + dz, hidden), jnp.float32)
    b1 = 0.1 * jax.random.normal(ks[1], (1, hidden), jnp.float32)
    w2 = 0.1 * jax.random.normal(ks[2], (hidden, hidden), jnp.float32)
    b2 = 0.1 * jax.random.normal(ks[3], (1, hidden), jnp.float32)
    w3 = 0.1 * jax.random.normal(ks[4], (hidden, 1), jnp.float32)
    b3 = 0.1 * jax.random.normal(ks[5], (1, 1), jnp.float32)
    return (w1, b1, w2, b2, w3, b3)


def reference_forward(x, z, params):
    w1, b1, w2, b2, w3, b3 = params
    xz = jnp.concatenate([x, z], axis=-1)
    h = jnp.maximum(xz @ w1 + b1, 0.0)
    h = jnp.maximum(h @ w2 + b2, 0.0)
    return h @ w3 + b3


if __name__ == "__main__":
    # Small but tiling-friendly shapes: grid = 512 / 256 = 2 (even, so the
    # parallel batch axis can shard across v7x's two TensorCores).
    B, Dx, Dz, H = 512, 16, 8, 32

    key = jax.random.PRNGKey(0)
    kx, kz, kp = jax.random.split(key, 3)
    x = jax.random.normal(kx, (B, Dx), jnp.float32)
    z = jax.random.normal(kz, (B, Dz), jnp.float32)
    params = init_params(kp, Dx, Dz, H)

    out = statistics_network(x, z, params, batch_tile=256)
    out = jax.block_until_ready(out)

    ref = reference_forward(x, z, params)
    assert out.shape == (B, 1)
    assert jnp.allclose(out, ref, atol=1e-5, rtol=1e-4), "mismatch vs JAX reference"

    print("KERNEL_OK")
</pallas_src>

<mosaic_0001>
module attributes {stable_mosaic.version = 11 : i64} {
  func.func @_stats_net_kernel(%arg0: i32, %arg1: memref<256x16xf32, #tpu.memory_space<vmem>>, %arg2: memref<256x8xf32, #tpu.memory_space<vmem>>, %arg3: memref<16x128xf32, #tpu.memory_space<vmem>>, %arg4: memref<8x128xf32, #tpu.memory_space<vmem>>, %arg5: memref<1x128xf32, #tpu.memory_space<vmem>>, %arg6: memref<128x128xf32, #tpu.memory_space<vmem>>, %arg7: memref<1x128xf32, #tpu.memory_space<vmem>>, %arg8: memref<1x128xf32, #tpu.memory_space<vmem>>, %arg9: memref<1x256xf32, #tpu.memory_space<vmem>>) attributes {dimension_semantics = [#tpu.dimension_semantics<parallel>], iteration_bounds = array<i64: 2>, scalar_prefetch = 0 : i64, scratch_operands = 0 : i64, tpu.core_type = #tpu.core_type<tc>, window_params = [{transform_indices = @transform_0, window_bounds = array<i64: 256, 16>}, {transform_indices = @transform_1, window_bounds = array<i64: 256, 8>}, {pipeline_mode = #tpu.pipeline_mode<synchronous>, transform_indices = @transform_2, window_bounds = array<i64: 16, 128>}, {pipeline_mode = #tpu.pipeline_mode<synchronous>, transform_indices = @transform_3, window_bounds = array<i64: 8, 128>}, {pipeline_mode = #tpu.pipeline_mode<synchronous>, transform_indices = @transform_4, window_bounds = array<i64: 1, 128>}, {pipeline_mode = #tpu.pipeline_mode<synchronous>, transform_indices = @transform_5, window_bounds = array<i64: 128, 128>}, {pipeline_mode = #tpu.pipeline_mode<synchronous>, transform_indices = @transform_6, window_bounds = array<i64: 1, 128>}, {pipeline_mode = #tpu.pipeline_mode<synchronous>, transform_indices = @transform_7, window_bounds = array<i64: 1, 128>}, {transform_indices = @transform_8, window_bounds = array<i64: 1, 256>}]} {
    %c0 = arith.constant 0 : index
    %c0_0 = arith.constant 0 : index
    %0 = vector.load %arg1[%c0, %c0_0] : memref<256x16xf32, #tpu.memory_space<vmem>>, vector<256x16xf32>
    %c0_1 = arith.constant 0 : index
    %c0_2 = arith.constant 0 : index
    %1 = vector.load %arg3[%c0_1, %c0_2] : memref<16x128xf32, #tpu.memory_space<vmem>>, vector<16x128xf32>
    %cst = arith.constant dense<0.000000e+00> : vector<256x128xf32>
    %2 = tpu.matmul %0, %1, %cst {dimension_numbers = #tpu.dot_dimension_numbers<[1], [0], [0], [1], [0, 0, 1, 1], [], []>} : vector<256x16xf32>, vector<16x128xf32>, vector<256x128xf32> -> vector<256x128xf32>
    %c0_3 = arith.constant 0 : index
    %c0_4 = arith.constant 0 : index
    %3 = vector.load %arg2[%c0_3, %c0_4] : memref<256x8xf32, #tpu.memory_space<vmem>>, vector<256x8xf32>
    %c0_5 = arith.constant 0 : index
    %c0_6 = arith.constant 0 : index
    %4 = vector.load %arg4[%c0_5, %c0_6] : memref<8x128xf32, #tpu.memory_space<vmem>>, vector<8x128xf32>
    %cst_7 = arith.constant dense<0.000000e+00> : vector<256x128xf32>
    %5 = tpu.matmul %3, %4, %cst_7 {dimension_numbers = #tpu.dot_dimension_numbers<[1], [0], [0], [1], [0, 0, 1, 1], [], []>} : vector<256x8xf32>, vector<8x128xf32>, vector<256x128xf32> -> vector<256x128xf32>
    %6 = arith.addf %2, %5 : vector<256x128xf32>
    %c0_8 = arith.constant 0 : index
    %c0_9 = arith.constant 0 : index
    %7 = vector.load %arg5[%c0_8, %c0_9] : memref<1x128xf32, #tpu.memory_space<vmem>>, vector<1x128xf32>
    %8 = vector.broadcast %7 : vector<1x128xf32> to vector<256x128xf32>
    %9 = arith.addf %6, %8 : vector<256x128xf32>
    %cst_10 = arith.constant 0.000000e+00 : f32
    %10 = vector.broadcast %cst_10 : f32 to vector<256x128xf32>
    %11 = arith.maximumf %9, %10 : vector<256x128xf32>
    %c0_11 = arith.constant 0 : index
    %c0_12 = arith.constant 0 : index
    %12 = vector.load %arg6[%c0_11, %c0_12] : memref<128x128xf32, #tpu.memory_space<vmem>>, vector<128x128xf32>
    %cst_13 = arith.constant dense<0.000000e+00> : vector<256x128xf32>
    %13 = tpu.matmul %11, %12, %cst_13 {dimension_numbers = #tpu.dot_dimension_numbers<[1], [0], [0], [1], [0, 0, 1, 1], [], []>} : vector<256x128xf32>, vector<128x128xf32>, vector<256x128xf32> -> vector<256x128xf32>
    %c0_14 = arith.constant 0 : index
    %c0_15 = arith.constant 0 : index
    %14 = vector.load %arg7[%c0_14, %c0_15] : memref<1x128xf32, #tpu.memory_space<vmem>>, vector<1x128xf32>
    %15 = vector.broadcast %14 : vector<1x128xf32> to vector<256x128xf32>
    %16 = arith.addf %13, %15 : vector<256x128xf32>
    %cst_16 = arith.constant 0.000000e+00 : f32
    %17 = vector.broadcast %cst_16 : f32 to vector<256x128xf32>
    %18 = arith.maximumf %16, %17 : vector<256x128xf32>
    %c0_17 = arith.constant 0 : index
    %c0_18 = arith.constant 0 : index
    %19 = vector.load %arg8[%c0_17, %c0_18] : memref<1x128xf32, #tpu.memory_space<vmem>>, vector<1x128xf32>
    %cst_19 = arith.constant dense<0.000000e+00> : vector<1x256xf32>
    %20 = tpu.matmul %19, %18, %cst_19 {dimension_numbers = #tpu.dot_dimension_numbers<[1], [1], [0], [0], [0, 0, 1, 0], [], []>} : vector<1x128xf32>, vector<256x128xf32>, vector<1x256xf32> -> vector<1x256xf32>
    %c0_20 = arith.constant 0 : index
    %c0_21 = arith.constant 0 : index
    %21 = vector.load %arg9[%c0_20, %c0_21] : memref<1x256xf32, #tpu.memory_space<vmem>>, vector<1x256xf32>
    tpu.vector_store %arg9[%c0_20, %c0_21], %20 {strides = array<i32>} : memref<1x256xf32, #tpu.memory_space<vmem>>, vector<1x256xf32>,
    return
  }
  func.func @transform_0(%arg0: i32) -> (i32, i32) {
    %c0_i32 = arith.constant 0 : i32
    %c0_i32_0 = arith.constant 0 : i32
    return %arg0, %c0_i32 : i32, i32
  }
  func.func @transform_1(%arg0: i32) -> (i32, i32) {
    %c0_i32 = arith.constant 0 : i32
    %c0_i32_0 = arith.constant 0 : i32
    return %arg0, %c0_i32 : i32, i32
  }
  func.func @transform_2(%arg0: i32) -> (i32, i32) {
    %c0_i32 = arith.constant 0 : i32
    %c0_i32_0 = arith.constant 0 : i32
    %c0_i32_1 = arith.constant 0 : i32
    return %c0_i32, %c0_i32_0 : i32, i32
  }
  func.func @transform_3(%arg0: i32) -> (i32, i32) {
    %c0_i32 = arith.constant 0 : i32
    %c0_i32_0 = arith.constant 0 : i32
    %c0_i32_1 = arith.constant 0 : i32
    return %c0_i32, %c0_i32_0 : i32, i32
  }
  func.func @transform_4(%arg0: i32) -> (i32, i32) {
    %c0_i32 = arith.constant 0 : i32
    %c0_i32_0 = arith.constant 0 : i32
    %c0_i32_1 = arith.constant 0 : i32
    return %c0_i32, %c0_i32_0 : i32, i32
  }
  func.func @transform_5(%arg0: i32) -> (i32, i32) {
    %c0_i32 = arith.constant 0 : i32
    %c0_i32_0 = arith.constant 0 : i32
    %c0_i32_1 = arith.constant 0 : i32
    return %c0_i32, %c0_i32_0 : i32, i32
  }
  func.func @transform_6(%arg0: i32) -> (i32, i32) {
    %c0_i32 = arith.constant 0 : i32
    %c0_i32_0 = arith.constant 0 : i32
    %c0_i32_1 = arith.constant 0 : i32
    return %c0_i32, %c0_i32_0 : i32, i32
  }
  func.func @transform_7(%arg0: i32) -> (i32, i32) {
    %c0_i32 = arith.constant 0 : i32
    %c0_i32_0 = arith.constant 0 : i32
    %c0_i32_1 = arith.constant 0 : i32
    return %c0_i32, %c0_i32_0 : i32, i32
  }
  func.func @transform_8(%arg0: i32) -> (i32, i32) {
    %c0_i32 = arith.constant 0 : i32
    %c0_i32_0 = arith.constant 0 : i32
    return %c0_i32, %arg0 : i32, i32
  }
}

</mosaic_0001>

<bundles_post_ra>
// kernel: tpu_custom_call.1
= control target key start
LH: loop header
LB: loop body
LE: loop exit
PB: predicated region body
PF: predicated region fallthrough
CT: control target
= control target key end

     0   :  { %13 = vsyncpa [#allocation3], 0  ;;  %s2638_s0 = inlined_call_operand.vmem [shape: f32[512,16], index: 0, kind: input, shape index: {}]   ;;  %s2639_s1 = inlined_call_operand.vmem [shape: f32[512,8], index: 1, kind: input, shape index: {}]   ;;  %s2640_s2 = inlined_call_operand.vmem [shape: f32[16,128], index: 2, kind: input, shape index: {}]   ;;  %s2641_s3 = inlined_call_operand.vmem [shape: f32[8,128], index: 3, kind: input, shape index: {}]   ;;  %s2642_s4 = inlined_call_operand.vmem [shape: f32[1,128], index: 4, kind: input, shape index: {}]   ;;  %s2643_s5 = inlined_call_operand.vmem [shape: f32[128,128], index: 5, kind: input, shape index: {}]   ;;  %s2644_s6 = inlined_call_operand.vmem [shape: f32[1,128], index: 6, kind: input, shape index: {}]   ;;  %s2645_s7 = inlined_call_operand.vmem [shape: f32[1,128], index: 7, kind: input, shape index: {}]   ;;  %s2646_s8 = inlined_call_operand.hbm [shape: f32[1,512], index: 8, kind: output, shape index: {}]  }
   0x1   :  { %15 = vsyncpa [#allocation3 + $0x1], 0  ;;  %s2235_s27 = smov 0   ;;  %s2237_s28 = smov 0  }
   0x2   :  { %s2239_s29 = smov 0   ;;  %s2241_s30 = smov 0  }
   0x3 LB: > { %s1571_s9 = sadd.s32 4294967295, %s2186_s30   ;;  %s1572_s10 = sadd.s32 4294967294, %s2186_s30   ;;  %s2186_s30 = sphi %s2241_s30, %s2652_s30   ;;  %s2182_s29 = sphi %s2239_s29, %s2651_s29   ;;  %s2178_s28 = sphi %s2237_s28, %s2650_s28   ;;  %s2174_s27 = sphi %s2235_s27, %s2649_s27  }
   0x4   : > { %s2258_s11 = sadd.s32 1, %s2186_s30   ;;  %s206_s12 = sadd.s32 1, %s2182_s29 }
   0x5   : > { %s203_s13 = ssub.s32 %s2186_s30, %s2258_s11  ;;  %p216_p0 = scmp.ne.s32.totalorder %s2182_s29, %s2178_s28 }
   0x6   : > { %p204_p1 = scmp.eq.s32.totalorder %s203_s13, 0  ;;  %p217_p2 = scmp.eq.s32.totalorder %s1571_s9, 1 }
   0x7   : > { %p222_p3 = scmp.ne.s32.totalorder %s2178_s28, %s2174_s27  ;;  %p223_p4 = scmp.eq.s32.totalorder %s1572_s10, 1 }
   0x8   : > { %s2268_s14 = scalar_select %p204_p1, %s2182_s29, %s206_s12  }
   0x9   : > { %p2270_p5 = por %p217_p2, %p216_p0  ;;  %p2274_p6 = por %p223_p4, %p222_p3 }
   0xa   : > { %p1575_p7 = scmp.ge.s32.totalorder %s2186_s30, 1  ;;  %p277_p8 = scmp.lt.s32.totalorder %s2186_s30, 3 }
   0xc   : > { %p278_p9 = pnand %p1575_p7, %p277_p8 }
   0xd   : > { %v395_v0 = vld [vmem:[%s2641_s3] sm:$0xff] (!%p278_p9)  ;;  %s2283_s19 = sshll.u32 (!%p278_p9), %s1571_s9, 5  ;;  %v362_v2 = vld [vmem:[%s2640_s2 + $0x8] sm:$0xff] (!%p278_p9)  ;;  %vm396_vm0 = vcmask (!%p278_p9), 64512   ;;  %v1113_v6 = vld [vmem:[%s2643_s5 + $0x10] sm:$0xff] (!%p278_p9)  ;;  %vm718_vm1 = vcmask (!%p278_p9), 130048  }
   0xe   : > { %281 = sbr.rel (%p278_p9) target bundleno = 857 (0x359), region = 52  ;;  %v361_v1 = vld [vmem:[%s2640_s2] sm:$0xff] (!%p278_p9)  ;;  %1802 = vmatprep.subr.mxu0 (!%p278_p9), %v395_v0  ;;  %p317_p10 = scmp.lt.s32.totalorder (!%p278_p9), %s2283_s19, 63  ;;  %v1112_v5 = vld [vmem:[%s2643_s5 + $0x8] sm:$0xff] (!%p278_p9)  ;;  %v1114_v8 = vld [vmem:[%s2643_s5 + $0x18] sm:$0xff] (!%p278_p9) }
   0xf   : > { %v1984_v3 = vpack.c.bf16 (!%p278_p9), %v362_v2, %v361_v1  ;;  %1803 = vmatpush3.msra.mxu0 (!%p278_p9), %v395_v0  ;;  %v1111_v4 = vld [vmem:[%s2643_s5] sm:$0xff] (!%p278_p9)  ;;  %v1116_v10 = vld [vmem:[%s2643_s5 + $0x28] sm:$0xff] (!%p278_p9)  ;;  %v1992_v14 = vpack.c.bf16 (!%p278_p9), %v1114_v8, %v1113_v6  ;;  %v1117_v26 = vld [vmem:[%s2643_s5 + $0x30] sm:$0xff] (!%p278_p9)  ;;  %s313_s26 = sand.u32 (!%p278_p9), 1, %s2178_s28   ;;  %s2596_s12 = scalar_lea.hbm (!%p278_p9), %s2646_s8, %s2283_s19 }
  0x10   : > { %v1988_v7 = vpack.c.bf16 (!%p278_p9), %v1112_v5, %v1111_v4  ;;  %v1115_v9 = vld [vmem:[%s2643_s5 + $0x20] sm:$0xff] (!%p278_p9)  ;;  %v1118_v27 = vld [vmem:[%s2643_s5 + $0x38] sm:$0xff] (!%p278_p9)  ;;  %v1120_v30 = vld [vmem:[%s2643_s5 + $0x48] sm:$0xff] (!%p278_p9)  ;;  %s1576_s9 = sshll.u32 (!%p278_p9), %s313_s26, 1  ;;  %s1487_s13 = scalar_lea.sflag (!%p278_p9), [#allocation3], %s313_s26 }
  0x11   : > { %1985 = vmatprep.subr.bf16.mxu0 (!%p278_p9), %v1984_v3  ;;  %v1996_v16 = vpack.c.bf16 (!%p278_p9), %v1116_v10, %v1115_v9  ;;  %v2000_v28 = vpack.c.bf16 (!%p278_p9), %v1118_v27, %v1117_v26  ;;  %v1119_v29 = vld [vmem:[%s2643_s5 + $0x40] sm:$0xff] (!%p278_p9)  ;;  %v1121_v33 = vld [vmem:[%s2643_s5 + $0x50] sm:$0xff] (!%p278_p9)  ;;  %v1122_v34 = vld [vmem:[%s2643_s5 + $0x58] sm:$0xff] (!%p278_p9)  ;;  %s2189_s18 = smov (!%p278_p9), [#allocation2]  }
  0x12   : > { %1989 = vmatprep.subr.bf16.mxu1 (!%p278_p9), %v1988_v7  ;;  %v2004_v32 = vpack.c.bf16 (!%p278_p9), %v1120_v30, %v1119_v29  ;;  %v2008_v36 = vpack.c.bf16 (!%p278_p9), %v1122_v34, %v1121_v33  ;;  %v1123_v38 = vld [vmem:[%s2643_s5 + $0x60] sm:$0xff] (!%p278_p9)  ;;  %v1124_v39 = vld [vmem:[%s2643_s5 + $0x68] sm:$0xff] (!%p278_p9)  ;;  %v1126_v26 = vld [vmem:[%s2643_s5 + $0x78] sm:$0xff] (!%p278_p9)  ;;  %s2128_s20 = sshll.u32 (!%p278_p9), %s2189_s18, 4  ;;  %s2129_s20 = int_to_ptr.vmem [resolvable:$false] %s2128_s20 }
  0x13   : > { %1991 = vmatpush3.bf16.msra.mxu1 (!%p278_p9), %v1988_v7  ;;  %v2012_v41 = vpack.c.bf16 (!%p278_p9), %v1124_v39, %v1123_v38  ;;  %s2130_s22 = scalar_lea.vmem (!%p278_p9), %s2129_s20, 64 }
  0x14   : > { %1993 = vmatprep.subr.bf16.mxu1 (!%p278_p9), %v1992_v14 }
  0x15   : > { %s2293_s24 = scalar_select %p317_p10, %s2283_s19, 63 }
  0x17   : > { %s1578_s25 = sshll.u32 %s2293_s24, 3  ;;  %1995 = vmatpush3.bf16.msra.mxu1 %v1992_v14 }
  0x18   : > { %s2310_s21 = scalar_lea.vmem %s2639_s1, %s1578_s25  ;;  %1997 = vmatprep.subr.bf16.mxu1 %v1996_v16  ;;  %s2410_s10 = scalar_lea.vmem %s2638_s0, %s1578_s25 }
  0x19   : > { %v363_v11 = vld [vmem:[%s2310_s21] sm:$0xff]  ;;  %v364_v12 = vld [vmem:[%s2310_s21 + $0x8] sm:$0xff]  ;;  %v365_v13 = vld [vmem:[%s2310_s21 + $0x10] sm:$0xff] }
  0x1a   : > { %1804 = vmatprep.mubr.msk.f32.mxu0 %vm396_vm0, %v363_v11  ;;  %v366_v15 = vld [vmem:[%s2310_s21 + $0x18] sm:$0xff]  ;;  %v367_v17 = vld [vmem:[%s2310_s21 + $0x20] sm:$0xff]  ;;  %v368_v18 = vld [vmem:[%s2310_s21 + $0x28] sm:$0xff] }
  0x1b   : > { %1805 = vmatmul.mubr.msk.f32.vlgmr.msra.gmra.mrb[0].mxu0 %vm396_vm0, %v364_v12  ;;  %v369_v19 = vld [vmem:[%s2310_s21 + $0x30] sm:$0xff]  ;;  %1999 = vmatpush3.bf16.msra.mxu1 %v1996_v16  ;;  %v370_v20 = vld [vmem:[%s2310_s21 + $0x38] sm:$0xff]  ;;  %v371_v21 = vld [vmem:[%s2310_s21 + $0x40] sm:$0xff] }
  0x1c   : > { %1987 = vmatpush3.bf16.msra.mxu0 %v1984_v3  ;;  %1807 = vmatprep.mubr.msk.f32.mxu0 %vm396_vm0, %v365_v13  ;;  %v372_v22 = vld [vmem:[%s2310_s21 + $0x48] sm:$0xff]  ;;  %v373_v23 = vld [vmem:[%s2310_s21 + $0x50] sm:$0xff]  ;;  %v374_v24 = vld [vmem:[%s2310_s21 + $0x58] sm:$0xff] }
  0x1d   : > { %v375_v25 = vld [vmem:[%s2310_s21 + $0x60] sm:$0xff]  ;;  %v376_v31 = vld [vmem:[%s2310_s21 + $0x68] sm:$0xff]  ;;  %v377_v35 = vld [vmem:[%s2310_s21 + $0x70] sm:$0xff]  ;;  %2001 = vmatprep.subr.bf16.mxu1 %v2000_v28 }
  0x1e   : > { %v378_v37 = vld [vmem:[%s2310_s21 + $0x78] sm:$0xff]  ;;  %v379_v40 = vld [vmem:[%s2310_s21 + $0x80] sm:$0xff]  ;;  %v380_v42 = vld [vmem:[%s2310_s21 + $0x88] sm:$0xff] }
  0x1f   : > { %1808 = vmatmul.mubr.msk.f32.gmra.mrb[2].mxu0 %vm396_vm0, %v366_v15  ;;  %2003 = vmatpush3.bf16.msra.mxu1 %v2000_v28  ;;  %v381_v43 = vld [vmem:[%s2310_s21 + $0x90] sm:$0xff]  ;;  %v382_v44 = vld [vmem:[%s2310_s21 + $0x98] sm:$0xff]  ;;  %v383_v45 = vld [vmem:[%s2310_s21 + $0xa0] sm:$0xff] }
  0x20   : > { %1810 = vmatprep.mubr.msk.f32.mxu0 %vm396_vm0, %v367_v17  ;;  %2005 = vmatprep.subr.bf16.mxu1 %v2004_v32  ;;  %v384_v46 = vld [vmem:[%s2310_s21 + $0xa8] sm:$0xff]  ;;  %v385_v47 = vld [vmem:[%s2310_s21 + $0xb0] sm:$0xff]  ;;  %v386_v48 = vld [vmem:[%s2310_s21 + $0xb8] sm:$0xff] }
  0x21   : > { %v387_v49 = vld [vmem:[%s2310_s21 + $0xc0] sm:$0xff]  ;;  %v388_v50 = vld [vmem:[%s2310_s21 + $0xc8] sm:$0xff]  ;;  %v389_v51 = vld [vmem:[%s2310_s21 + $0xd0] sm:$0xff] }
  0x22   : > { %v390_v52 = vld [vmem:[%s2310_s21 + $0xd8] sm:$0xff]  ;;  %v391_v53 = vld [vmem:[%s2310_s21 + $0xe0] sm:$0xff]  ;;  %v392_v54 = vld [vmem:[%s2310_s21 + $0xe8] sm:$0xff] }
  0x23   : > { %1811 = vmatmul.mubr.msk.f32.gmra.mrb[4].mxu0 %vm396_vm0, %v368_v18  ;;  %2007 = vmatpush3.bf16.msra.mxu1 %v2004_v32  ;;  %v393_v55 = vld [vmem:[%s2310_s21 + $0xf0] sm:$0xff]  ;;  %v394_v56 = vld [vmem:[%s2310_s21 + $0xf8] sm:$0xff]  ;;  %v329_v57 = vld [vmem:[%s2410_s10] sm:$0xff] }
  0x24   : > { %1813 = vmatprep.mubr.msk.f32.mxu0 %vm396_vm0, %v369_v19  ;;  %2009 = vmatprep.subr.bf16.mxu1 %v2008_v36  ;;  %v330_v58 = vld [vmem:[%s2410_s10 + $0x8] sm:$0xff]  ;;  %v331_v59 = vld [vmem:[%s2410_s10 + $0x10] sm:$0xff]  ;;  %v332_v60 = vld [vmem:[%s2410_s10 + $0x18] sm:$0xff] }
  0x25   : > { %v333_v61 = vld [vmem:[%s2410_s10 + $0x20] sm:$0xff]  ;;  %v334_v62 = vld [vmem:[%s2410_s10 + $0x28] sm:$0xff]  ;;  %v335_v63 = vld [vmem:[%s2410_s10 + $0x30] sm:$0xff] }
  0x26   : > { %v336_v0 = vld [vmem:[%s2410_s10 + $0x38] sm:$0xff]  ;;  %v337_v1 = vld [vmem:[%s2410_s10 + $0x40] sm:$0xff]  ;;  %v338_v2 = vld [vmem:[%s2410_s10 + $0x48] sm:$0xff] }
  0x27   : > { %1814 = vmatmul.mubr.msk.f32.gmra.mrb[6].mxu0 %vm396_vm0, %v370_v20  ;;  %2011 = vmatpush3.bf16.msra.mxu1 %v2008_v36  ;;  %v339_v3 = vld [vmem:[%s2410_s10 + $0x50] sm:$0xff]  ;;  %v340_v4 = vld [vmem:[%s2410_s10 + $0x58] sm:$0xff]  ;;  %v341_v5 = vld [vmem:[%s2410_s10 + $0x60] sm:$0xff] }
  0x28   : > { %1816 = vmatprep.mubr.msk.f32.mxu0 %vm396_vm0, %v371_v21  ;;  %2013 = vmatprep.subr.bf16.mxu1 %v2012_v41  ;;  %v342_v6 = vld [vmem:[%s2410_s10 + $0x68] sm:$0xff]  ;;  %v343_v7 = vld [vmem:[%s2410_s10 + $0x70] sm:$0xff]  ;;  %v344_v8 = vld [vmem:[%s2410_s10 + $0x78] sm:$0xff] }
  0x29   : > { %v345_v9 = vld [vmem:[%s2410_s10 + $0x80] sm:$0xff]  ;;  %v346_v10 = vld [vmem:[%s2410_s10 + $0x88] sm:$0xff]  ;;  %v347_v11 = vld [vmem:[%s2410_s10 + $0x90] sm:$0xff] }
  0x2a   : > { %v348_v12 = vld [vmem:[%s2410_s10 + $0x98] sm:$0xff]  ;;  %v349_v13 = vld [vmem:[%s2410_s10 + $0xa0] sm:$0xff]  ;;  %v350_v14 = vld [vmem:[%s2410_s10 + $0xa8] sm:$0xff] }
  0x2b   : > { %1817 = vmatmul.mubr.msk.f32.gmra.mrb[8].mxu0 %vm396_vm0, %v372_v22  ;;  %2015 = vmatpush3.bf16.msra.mxu1 %v2012_v41  ;;  %v351_v15 = vld [vmem:[%s2410_s10 + $0xb0] sm:$0xff]  ;;  %v352_v16 = vld [vmem:[%s2410_s10 + $0xb8] sm:$0xff]  ;;  %v353_v17 = vld [vmem:[%s2410_s10 + $0xc0] sm:$0xff] }
  0x2c   : > { %1819 = vmatprep.mubr.msk.f32.mxu0 %vm396_vm0, %v373_v23  ;;  %v354_v18 = vld [vmem:[%s2410_s10 + $0xc8] sm:$0xff]  ;;  %v355_v19 = vld [vmem:[%s2410_s10 + $0xd0] sm:$0xff]  ;;  %v356_v20 = vld [vmem:[%s2410_s10 + $0xd8] sm:$0xff] }
  0x2d   : > { %v357_v21 = vld [vmem:[%s2410_s10 + $0xe0] sm:$0xff]  ;;  %v358_v22 = vld [vmem:[%s2410_s10 + $0xe8] sm:$0xff]  ;;  %v359_v23 = vld [vmem:[%s2410_s10 + $0xf0] sm:$0xff] }
  0x2e   : > { %v2489_v28 = vld [vmem:[%s2642_s4] ss:$0 sm:$0xff] }
  0x2f   : > { %1820 = vmatmul.mubr.msk.f32.gmra.mrb[10].mxu0 %vm396_vm0, %v374_v24  ;;  %v360_v24 = vld [vmem:[%s2410_s10 + $0xf8] sm:$0xff]  ;;  %s315_s10 = scalar_lea.vmem [#allocation2], %s1576_s9 }
  0x30   : > { %1822 = vmatprep.mubr.msk.f32.mxu0 %vm396_vm0, %v375_v25  ;;  %v1125_v25 = vld [vmem:[%s2643_s5 + $0x70] sm:$0xff]  ;;  %s1501_s24 = sshll.u32 %s315_s10, 4  ;;  %s2598_s24 = int_to_ptr.vmem [resolvable:$true] %s1501_s24 }
  0x31   : > { %v2016_v27 = vpack.c.bf16 %v1126_v26, %v1125_v25  ;;  %s2124_s17 = scalar_lea.vmem %s2598_s24, 32  ;;  %p2131_p0 = scmp.lt.s32.totalorder %s2598_s24, %s2129_s20 }
  0x32   : > { %p2125_p11 = scmp.ne.s32.totalorder %s2598_s24, %s2124_s17  ;;  %p2132_p1 = scmp.lt.s32.totalorder %s2130_s22, %s2124_s17 }
  0x33   : > { %1823 = vmatmul.mubr.msk.f32.gmra.mrb[12].mxu0 %vm396_vm0, %v376_v31  ;;  %2017 = vmatprep.subr.bf16.mxu1 %v2016_v27 }
  0x34   : > { %1825 = vmatprep.mubr.msk.f32.mxu0 %vm396_vm0, %v377_v35  ;;  %2019 = vmatpush3.bf16.msra.mxu1 %v2016_v27  ;;  %p2126_p12 = pnand %p2125_p11, %p2270_p5  ;;  %p2133_p2 = por %p2132_p1, %p2131_p0 }
  0x36   : > { %p2127_p13 = pneg %p2126_p12 }
  0x37   : > { %1826 = vmatmul.mubr.msk.f32.gmra.mrb[14].mxu0 %vm396_vm0, %v378_v37 }
  0x38   : > { %1828 = vmatprep.mubr.msk.f32.mxu0 %vm396_vm0, %v379_v40  ;;  %p2134_p3 = pnand %p2133_p2, %p2127_p13 }
  0x3b   : > { %1829 = vmatmul.mubr.msk.f32.gmra.mrb[16].mxu0 %vm396_vm0, %v380_v42 }
  0x3c   : > { %1831 = vmatprep.mubr.msk.f32.mxu0 %vm396_vm0, %v381_v43 }
  0x3f   : > { %1832 = vmatmul.mubr.msk.f32.gmra.mrb[18].mxu0 %vm396_vm0, %v382_v44 }
  0x40   : > { %1834 = vmatprep.mubr.msk.f32.mxu0 %vm396_vm0, %v383_v45 }
  0x43   : > { %1835 = vmatmul.mubr.msk.f32.gmra.mrb[20].mxu0 %vm396_vm0, %v384_v46 }
  0x44   : > { %1837 = vmatprep.mubr.msk.f32.mxu0 %vm396_vm0, %v385_v47 }
  0x47   : > { %1838 = vmatmul.mubr.msk.f32.gmra.mrb[22].mxu0 %vm396_vm0, %v386_v48 }
  0x48   : > { %1840 = vmatprep.mubr.msk.f32.mxu0 %vm396_vm0, %v387_v49 }
  0x4b   : > { %1841 = vmatmul.mubr.msk.f32.gmra.mrb[24].mxu0 %vm396_vm0, %v388_v50 }
  0x4c   : > { %1843 = vmatprep.mubr.msk.f32.mxu0 %vm396_vm0, %v389_v51 }
  0x4f   : > { %1844 = vmatmul.mubr.msk.f32.gmra.mrb[26].mxu0 %vm396_vm0, %v390_v52 }
  0x50   : > { %1846 = vmatprep.mubr.msk.f32.mxu0 %vm396_vm0, %v391_v53 }
  0x53   : > { %1847 = vmatmul.mubr.msk.f32.gmra.mrb[28].mxu0 %vm396_vm0, %v392_v54 }
  0x54   : > { %1849 = vmatprep.mubr.msk.f32.mxu0 %vm396_vm0, %v393_v55 }
  0x57   : > { %1850 = vmatmul.mubr.msk.f32.gmra.mrb[30].mxu0 %vm396_vm0, %v394_v56 }
  0x58   : > { %1856 = vmatprep.mubr.msk.f32.mxu0 %vm718_vm1, %v329_v57 }
  0x5b   : > { %1857 = vmatmul.mubr.msk.f32.vlgmr.msra.gmra.mrb[0].mxu0 %vm718_vm1, %v330_v58 }
  0x5c   : > { %1859 = vmatprep.mubr.msk.f32.mxu0 %vm718_vm1, %v331_v59 }
  0x5f   : > { %1860 = vmatmul.mubr.msk.f32.gmra.mrb[2].mxu0 %vm718_vm1, %v332_v60 }
  0x60   : > { %1862 = vmatprep.mubr.msk.f32.mxu0 %vm718_vm1, %v333_v61 }
  0x63   : > { %1863 = vmatmul.mubr.msk.f32.gmra.mrb[4].mxu0 %vm718_vm1, %v334_v62 }
  0x64   : > { %1865 = vmatprep.mubr.msk.f32.mxu0 %vm718_vm1, %v335_v63 }
  0x67   : > { %1866 = vmatmul.mubr.msk.f32.gmra.mrb[6].mxu0 %vm718_vm1, %v336_v0 }
  0x68   : > { %1868 = vmatprep.mubr.msk.f32.mxu0 %vm718_vm1, %v337_v1 }
  0x6b   : > { %1869 = vmatmul.mubr.msk.f32.gmra.mrb[8].mxu0 %vm718_vm1, %v338_v2 }
  0x6c   : > { %1871 = vmatprep.mubr.msk.f32.mxu0 %vm718_vm1, %v339_v3 }
  0x6f   : > { %1872 = vmatmul.mubr.msk.f32.gmra.mrb[10].mxu0 %vm718_vm1, %v340_v4 }
  0x70   : > { %1874 = vmatprep.mubr.msk.f32.mxu0 %vm718_vm1, %v341_v5 }
  0x73   : > { %1875 = vmatmul.mubr.msk.f32.gmra.mrb[12].mxu0 %vm718_vm1, %v342_v6 }
  0x74   : > { %1877 = vmatprep.mubr.msk.f32.mxu0 %vm718_vm1, %v343_v7 }
  0x77   : > { %1878 = vmatmul.mubr.msk.f32.gmra.mrb[14].mxu0 %vm718_vm1, %v344_v8 }
  0x78   : > { %1880 = vmatprep.mubr.msk.f32.mxu0 %vm718_vm1, %v345_v9 }
  0x7b   : > { %1881 = vmatmul.mubr.msk.f32.gmra.mrb[16].mxu0 %vm718_vm1, %v346_v10 }
  0x7c   : > { %1883 = vmatprep.mubr.msk.f32.mxu0 %vm718_vm1, %v347_v11 }
  0x7f   : > { %1884 = vmatmul.mubr.msk.f32.gmra.mrb[18].mxu0 %vm718_vm1, %v348_v12 }
  0x80   : > { %1886 = vmatprep.mubr.msk.f32.mxu0 %vm718_vm1, %v349_v13 }
  0x83   : > { %1887 = vmatmul.mubr.msk.f32.gmra.mrb[20].mxu0 %vm718_vm1, %v350_v14 }
  0x84   : > { %1889 = vmatprep.mubr.msk.f32.mxu0 %vm718_vm1, %v351_v15 }
  0x87   : > { %1890 = vmatmul.mubr.msk.f32.gmra.mrb[22].mxu0 %vm718_vm1, %v352_v16 }
  0x88   : > { %1892 = vmatprep.mubr.msk.f32.mxu0 %vm718_vm1, %v353_v17 }
  0x8b   : > { %1893 = vmatmul.mubr.msk.f32.gmra.mrb[24].mxu0 %vm718_vm1, %v354_v18 }
  0x8c   : > { %1895 = vmatprep.mubr.msk.f32.mxu0 %vm718_vm1, %v355_v19 }
  0x8f   : > { %1896 = vmatmul.mubr.msk.f32.gmra.mrb[26].mxu0 %vm718_vm1, %v356_v20 }
  0x90   : > { %1898 = vmatprep.mubr.msk.f32.mxu0 %vm718_vm1, %v357_v21 }
  0x93   : > { %1899 = vmatmul.mubr.msk.f32.gmra.mrb[28].mxu0 %vm718_vm1, %v358_v22 }
  0x94   : > { %1901 = vmatprep.mubr.msk.f32.mxu0 %vm718_vm1, %v359_v23 }
  0x97   : > { %1902 = vmatmul.mubr.msk.f32.gmra.mrb[30].mxu0 %vm718_vm1, %v360_v24 }
 0x12e   : > { %v1858_v29 = vpop.f32.mrb[0].mxu0 }
 0x12f   : > { %v1048_v30 = vadd.f32 %v1858_v29, %v2489_v28  ;;  %v881_v31 = vpop.f32.mrb[1].mxu0 }
 0x130   : > { %v1047_v32 = vadd.f32 %v2489_v28, %v881_v31 }
 0x131   : > { %v1080_v35 = vmax.f32 %v1048_v30, 0.0 }
 0x132   : > { %v1861_v33 = vpop.f32.mrb[2].mxu0  ;;  %v1079_v34 = vmax.f32 %v1047_v32, 0.0 }
 0x133   : > { %v1050_v36 = vadd.f32 %v1861_v33, %v2489_v28  ;;  %v891_v37 = vpop.f32.mrb[3].mxu0 }
 0x134   : > { %v1049_v38 = vadd.f32 %v2489_v28, %v891_v37  ;;  %1936 = vmatprep.mubr.f32.mxu1 %v1079_v34 }
 0x135   : > { %1937 = vmatmul.mubr.f32.vlgmr.msra.gmra.mrb[0].mxu1 %v1080_v35  ;;  %v1082_v41 = vmax.f32 %v1050_v36, 0.0 }
 0x136   : > { %v1081_v39 = vmax.f32 %v1049_v38, 0.0  ;;  %v1864_v40 = vpop.f32.mrb[4].mxu0 }
 0x137   : > { %v1052_v42 = vadd.f32 %v1864_v40, %v2489_v28  ;;  %v901_v43 = vpop.f32.mrb[5].mxu0 }
 0x138   : > { %v1051_v44 = vadd.f32 %v2489_v28, %v901_v43  ;;  %1939 = vmatprep.mubr.f32.mxu1 %v1081_v39 }
 0x139   : > { %1940 = vmatmul.mubr.f32.gmra.mrb[2].mxu1 %v1082_v41  ;;  %v1084_v47 = vmax.f32 %v1052_v42, 0.0 }
 0x13a   : > { %v1083_v45 = vmax.f32 %v1051_v44, 0.0  ;;  %v1867_v46 = vpop.f32.mrb[6].mxu0 }
 0x13b   : > { %v1054_v48 = vadd.f32 %v1867_v46, %v2489_v28  ;;  %v911_v49 = vpop.f32.mrb[7].mxu0 }
 0x13c   : > { %v1053_v50 = vadd.f32 %v2489_v28, %v911_v49  ;;  %1942 = vmatprep.mubr.f32.mxu1 %v1083_v45 }
 0x13d   : > { %1943 = vmatmul.mubr.f32.gmra.mrb[4].mxu1 %v1084_v47  ;;  %v1086_v53 = vmax.f32 %v1054_v48, 0.0 }
 0x13e   : > { %v1085_v51 = vmax.f32 %v1053_v50, 0.0  ;;  %v1870_v52 = vpop.f32.mrb[8].mxu0 }
 0x13f   : > { %v1056_v54 = vadd.f32 %v1870_v52, %v2489_v28  ;;  %v921_v55 = vpop.f32.mrb[9].mxu0 }
 0x140   : > { %v1055_v56 = vadd.f32 %v2489_v28, %v921_v55  ;;  %1945 = vmatprep.mubr.f32.mxu1 %v1085_v51 }
 0x141   : > { %1946 = vmatmul.mubr.f32.gmra.mrb[6].mxu1 %v1086_v53  ;;  %v1088_v59 = vmax.f32 %v1056_v54, 0.0 }
 0x142   : > { %v1087_v57 = vmax.f32 %v1055_v56, 0.0  ;;  %v1873_v58 = vpop.f32.mrb[10].mxu0 }
 0x143   : > { %v1058_v60 = vadd.f32 %v1873_v58, %v2489_v28  ;;  %v931_v61 = vpop.f32.mrb[11].mxu0 }
 0x144   : > { %v1057_v62 = vadd.f32 %v2489_v28, %v931_v61  ;;  %1948 = vmatprep.mubr.f32.mxu1 %v1087_v57 }
 0x145   : > { %1949 = vmatmul.mubr.f32.gmra.mrb[8].mxu1 %v1088_v59  ;;  %v1090_v1 = vmax.f32 %v1058_v60, 0.0 }
 0x146   : > { %v1089_v63 = vmax.f32 %v1057_v62, 0.0  ;;  %v1876_v0 = vpop.f32.mrb[12].mxu0  ;;  %v2526_v62 = vld [vmem:[%s2645_s7] sm:$0x1] }
 0x147   : > { %v1060_v2 = vadd.f32 %v1876_v0, %v2489_v28  ;;  %v941_v3 = vpop.f32.mrb[13].mxu0 }
 0x148   : > { %v1059_v4 = vadd.f32 %v2489_v28, %v941_v3  ;;  %1951 = vmatprep.mubr.f32.mxu1 %v1089_v63  ;;  %v2532_v63 = vld [vmem:[%s2644_s6] ss:$0 sm:$0xff] }
 0x149   : > { %1952 = vmatmul.mubr.f32.gmra.mrb[10].mxu1 %v1090_v1  ;;  %v1092_v7 = vmax.f32 %v1060_v2, 0.0 }
 0x14a   : > { %v1091_v5 = vmax.f32 %v1059_v4, 0.0  ;;  %v1879_v6 = vpop.f32.mrb[14].mxu0 }
 0x14b   : > { %v1062_v8 = vadd.f32 %v1879_v6, %v2489_v28  ;;  %v951_v9 = vpop.f32.mrb[15].mxu0 }
 0x14c   : > { %v1061_v10 = vadd.f32 %v2489_v28, %v951_v9  ;;  %1954 = vmatprep.mubr.f32.mxu1 %v1091_v5 }
 0x14d   : > { %1955 = vmatmul.mubr.f32.gmra.mrb[12].mxu1 %v1092_v7  ;;  %v1094_v13 = vmax.f32 %v1062_v8, 0.0 }
 0x14e   : > { %v1093_v11 = vmax.f32 %v1061_v10, 0.0  ;;  %v1882_v12 = vpop.f32.mrb[16].mxu0 }
 0x14f   : > { %v1064_v14 = vadd.f32 %v1882_v12, %v2489_v28  ;;  %v961_v15 = vpop.f32.mrb[17].mxu0 }
 0x150   : > { %v1063_v16 = vadd.f32 %v2489_v28, %v961_v15  ;;  %1957 = vmatprep.mubr.f32.mxu1 %v1093_v11 }
 0x151   : > { %1958 = vmatmul.mubr.f32.gmra.mrb[14].mxu1 %v1094_v13  ;;  %v1096_v19 = vmax.f32 %v1064_v14, 0.0 }
 0x152   : > { %v1095_v17 = vmax.f32 %v1063_v16, 0.0  ;;  %v1885_v18 = vpop.f32.mrb[18].mxu0 }
 0x153   : > { %v1066_v20 = vadd.f32 %v1885_v18, %v2489_v28  ;;  %v971_v21 = vpop.f32.mrb[19].mxu0 }
 0x154   : > { %v1065_v22 = vadd.f32 %v2489_v28, %v971_v21  ;;  %1960 = vmatprep.mubr.f32.mxu1 %v1095_v17 }
 0x155   : > { %1961 = vmatmul.mubr.f32.gmra.mrb[16].mxu1 %v1096_v19  ;;  %v1098_v25 = vmax.f32 %v1066_v20, 0.0 }
 0x156   : > { %v1097_v23 = vmax.f32 %v1065_v22, 0.0  ;;  %v1888_v24 = vpop.f32.mrb[20].mxu0 }
 0x157   : > { %v1068_v26 = vadd.f32 %v1888_v24, %v2489_v28  ;;  %v981_v27 = vpop.f32.mrb[21].mxu0 }
 0x158   : > { %v1067_v29 = vadd.f32 %v2489_v28, %v981_v27  ;;  %1963 = vmatprep.mubr.f32.mxu1 %v1097_v23 }
 0x159   : > { %1964 = vmatmul.mubr.f32.gmra.mrb[18].mxu1 %v1098_v25  ;;  %v1100_v32 = vmax.f32 %v1068_v26, 0.0 }
 0x15a   : > { %v1099_v30 = vmax.f32 %v1067_v29, 0.0  ;;  %v1891_v31 = vpop.f32.mrb[22].mxu0 }
 0x15b   : > { %v1070_v33 = vadd.f32 %v1891_v31, %v2489_v28  ;;  %v991_v34 = vpop.f32.mrb[23].mxu0 }
 0x15c   : > { %v1069_v35 = vadd.f32 %v2489_v28, %v991_v34  ;;  %1966 = vmatprep.mubr.f32.mxu1 %v1099_v30 }
 0x15d   : > { %1967 = vmatmul.mubr.f32.gmra.mrb[20].mxu1 %v1100_v32  ;;  %v1102_v38 = vmax.f32 %v1070_v33, 0.0 }
 0x15e   : > { %v1101_v36 = vmax.f32 %v1069_v35, 0.0  ;;  %v1894_v37 = vpop.f32.mrb[24].mxu0 }
 0x15f   : > { %v1072_v39 = vadd.f32 %v1894_v37, %v2489_v28  ;;  %v1001_v40 = vpop.f32.mrb[25].mxu0 }
 0x160   : > { %v1071_v41 = vadd.f32 %v2489_v28, %v1001_v40  ;;  %1969 = vmatprep.mubr.f32.mxu1 %v1101_v36 }
 0x161   : > { %1970 = vmatmul.mubr.f32.gmra.mrb[22].mxu1 %v1102_v38  ;;  %v1104_v44 = vmax.f32 %v1072_v39, 0.0 }
 0x162   : > { %v1103_v42 = vmax.f32 %v1071_v41, 0.0  ;;  %v1897_v43 = vpop.f32.mrb[26].mxu0 }
 0x163   : > { %v1074_v45 = vadd.f32 %v1897_v43, %v2489_v28  ;;  %v1011_v46 = vpop.f32.mrb[27].mxu0 }
 0x164   : > { %v1073_v47 = vadd.f32 %v2489_v28, %v1011_v46  ;;  %1972 = vmatprep.mubr.f32.mxu1 %v1103_v42 }
 0x165   : > { %1973 = vmatmul.mubr.f32.gmra.mrb[24].mxu1 %v1104_v44  ;;  %v1106_v50 = vmax.f32 %v1074_v45, 0.0 }
 0x166   : > { %v1105_v48 = vmax.f32 %v1073_v47, 0.0  ;;  %v1900_v49 = vpop.f32.mrb[28].mxu0 }
 0x167   : > { %v1076_v51 = vadd.f32 %v1900_v49, %v2489_v28  ;;  %v1021_v52 = vpop.f32.mrb[29].mxu0 }
 0x168   : > { %v1075_v53 = vadd.f32 %v2489_v28, %v1021_v52  ;;  %1975 = vmatprep.mubr.f32.mxu1 %v1105_v48 }
 0x169   : > { %1976 = vmatmul.mubr.f32.gmra.mrb[26].mxu1 %v1106_v50  ;;  %v1108_v56 = vmax.f32 %v1076_v51, 0.0 }
 0x16a   : > { %v1107_v54 = vmax.f32 %v1075_v53, 0.0  ;;  %v1903_v55 = vpop.f32.mrb[30].mxu0 }
 0x16b   : > { %v1078_v57 = vadd.f32 %v1903_v55, %v2489_v28  ;;  %v1031_v58 = vpop.f32.mrb[31].mxu0 }
 0x16c   : > { %v1077_v59 = vadd.f32 %v2489_v28, %v1031_v58  ;;  %1978 = vmatprep.mubr.f32.mxu1 %v1107_v54 }
 0x16d   : > { %1979 = vmatmul.mubr.f32.gmra.mrb[28].mxu1 %v1108_v56  ;;  %v1110_v61 = vmax.f32 %v1078_v57, 0.0 }
 0x16e   : > { %v1109_v60 = vmax.f32 %v1077_v59, 0.0 }
 0x170   : > { %1981 = vmatprep.mubr.f32.mxu1 %v1109_v60 }
 0x171   : > { %1982 = vmatmul.mubr.f32.gmra.mrb[30].mxu1 %v1110_v61 }
 0x172   : > { %1800 = vmatprep.mubr.f32.mxu1 %v2526_v62 }
 0x208   : > { %v1938_v0 = vpop.f32.mrb[0].mxu1 }
 0x209   : > { %v1206_v28 = vadd.f32 %v1938_v0, %v2532_v63  ;;  %v1200_v1 = vpop.f32.mrb[1].mxu1 }
 0x20a   : > { %v1201_v2 = vadd.f32 %v2532_v63, %v1200_v1 }
 0x20b   : > { %v1360_v3 = vmax.f32 %v1206_v28, 0.0 }
 0x20c   : > { %v1359_v4 = vmax.f32 %v1201_v2, 0.0  ;;  %v1941_v5 = vpop.f32.mrb[2].mxu1 }
 0x20d   : > { %v1216_v6 = vadd.f32 %v1941_v5, %v2532_v63  ;;  %v1210_v7 = vpop.f32.mrb[3].mxu1 }
 0x20e   : > { %v2537_v8 = vpack.c.bf16 %v1360_v3, %v1359_v4  ;;  %v1211_v9 = vadd.f32 %v2532_v63, %v1210_v7 }
 0x20f   : > { %v1362_v10 = vmax.f32 %v1216_v6, 0.0 }
 0x210   : > { %v1361_v11 = vmax.f32 %v1211_v9, 0.0  ;;  %v1944_v12 = vpop.f32.mrb[4].mxu1 }
 0x211   : > { %v1226_v13 = vadd.f32 %v1944_v12, %v2532_v63  ;;  %v1220_v14 = vpop.f32.mrb[5].mxu1 }
 0x212   : > { %v2541_v15 = vpack.c.bf16 %v1362_v10, %v1361_v11  ;;  %v1221_v16 = vadd.f32 %v2532_v63, %v1220_v14 }
 0x213   : > { %v1364_v17 = vmax.f32 %v1226_v13, 0.0 }
 0x214   : > { %v1363_v18 = vmax.f32 %v1221_v16, 0.0  ;;  %v1947_v19 = vpop.f32.mrb[6].mxu1 }
 0x215   : > { %v1236_v20 = vadd.f32 %v1947_v19, %v2532_v63  ;;  %v1230_v21 = vpop.f32.mrb[7].mxu1 }
 0x216   : > { %v2545_v22 = vpack.c.bf16 %v1364_v17, %v1363_v18  ;;  %v1231_v23 = vadd.f32 %v2532_v63, %v1230_v21 }
 0x217   : > { %v1366_v24 = vmax.f32 %v1236_v20, 0.0 }
 0x218   : > { %v1365_v25 = vmax.f32 %v1231_v23, 0.0  ;;  %v1950_v26 = vpop.f32.mrb[8].mxu1 }
 0x219   : > { %v1246_v27 = vadd.f32 %v1950_v26, %v2532_v63  ;;  %v1240_v29 = vpop.f32.mrb[9].mxu1 }
 0x21a   : > { %v2549_v30 = vpack.c.bf16 %v1366_v24, %v1365_v25  ;;  %v1241_v31 = vadd.f32 %v2532_v63, %v1240_v29 }
 0x21b   : > { %v1368_v32 = vmax.f32 %v1246_v27, 0.0 }
 0x21c   : > { %v1367_v33 = vmax.f32 %v1241_v31, 0.0  ;;  %v1953_v34 = vpop.f32.mrb[10].mxu1 }
 0x21d   : > { %v1256_v35 = vadd.f32 %v1953_v34, %v2532_v63  ;;  %v1250_v36 = vpop.f32.mrb[11].mxu1 }
 0x21e   : > { %v2553_v37 = vpack.c.bf16 %v1368_v32, %v1367_v33  ;;  %v1251_v38 = vadd.f32 %v2532_v63, %v1250_v36 }
 0x21f   : > { %v1370_v39 = vmax.f32 %v1256_v35, 0.0 }
 0x220   : > { %v1369_v40 = vmax.f32 %v1251_v38, 0.0  ;;  %v1956_v41 = vpop.f32.mrb[12].mxu1 }
 0x221   : > { %v1266_v42 = vadd.f32 %v1956_v41, %v2532_v63  ;;  %v1260_v43 = vpop.f32.mrb[13].mxu1 }
 0x222   : > { %v2557_v44 = vpack.c.bf16 %v1370_v39, %v1369_v40  ;;  %v1261_v45 = vadd.f32 %v2532_v63, %v1260_v43 }
 0x223   : > { %v1372_v46 = vmax.f32 %v1266_v42, 0.0 }
 0x224   : > { %v1371_v47 = vmax.f32 %v1261_v45, 0.0  ;;  %v1959_v48 = vpop.f32.mrb[14].mxu1 }
 0x225   : > { %v1276_v49 = vadd.f32 %v1959_v48, %v2532_v63  ;;  %v1270_v50 = vpop.f32.mrb[15].mxu1 }
 0x226   : > { %v2561_v51 = vpack.c.bf16 %v1372_v46, %v1371_v47  ;;  %v1271_v52 = vadd.f32 %v2532_v63, %v1270_v50 }
 0x227   : > { %v1374_v53 = vmax.f32 %v1276_v49, 0.0 }
 0x228   : > { %v1373_v54 = vmax.f32 %v1271_v52, 0.0  ;;  %v1962_v55 = vpop.f32.mrb[16].mxu1 }
 0x229   : > { %v1286_v56 = vadd.f32 %v1962_v55, %v2532_v63  ;;  %v1280_v57 = vpop.f32.mrb[17].mxu1  ;;  %v1469_v55 = vlaneseq }
 0x22a   : > { %v2565_v58 = vpack.c.bf16 %v1374_v53, %v1373_v54  ;;  %v1281_v59 = vadd.f32 %v2532_v63, %v1280_v57 }
 0x22b   : > { %v1376_v60 = vmax.f32 %v1286_v56, 0.0  ;;  %v1470_v56 = vshrl.u32 %v1469_v55, 7  ;;  %vm1483_vm2 = vcmp.lt.s32.totalorder %v1469_v55, 256 }
 0x22c   : > { %v1375_v61 = vmax.f32 %v1281_v59, 0.0  ;;  %v1965_v0 = vpop.f32.mrb[18].mxu1 }
 0x22d   : > { %v1296_v28 = vadd.f32 %v1965_v0, %v2532_v63  ;;  %v1290_v1 = vpop.f32.mrb[19].mxu1 }
 0x22e   : > { %v2020_v2 = vpack.c.bf16 %v1376_v60, %v1375_v61  ;;  %v1291_v3 = vadd.f32 %v2532_v63, %v1290_v1 }
 0x22f   : > { %v1378_v4 = vmax.f32 %v1296_v28, 0.0 }
 0x230   : > { %v1377_v5 = vmax.f32 %v1291_v3, 0.0  ;;  %v1968_v6 = vpop.f32.mrb[20].mxu1  ;;  %2021 = vmatprep.subr.bf16.mxu1 %v2020_v2 }
 0x231   : > { %v1306_v7 = vadd.f32 %v1968_v6, %v2532_v63  ;;  %v1300_v9 = vpop.f32.mrb[21].mxu1  ;;  %2023 = vmatpush3.bf16.xpose.msra.mxu1 %v2537_v8 }
 0x232   : > { %v2024_v10 = vpack.c.bf16 %v1378_v4, %v1377_v5  ;;  %v1301_v11 = vadd.f32 %v2532_v63, %v1300_v9 }
 0x233   : > { %v1380_v12 = vmax.f32 %v1306_v7, 0.0 }
 0x234   : > { %v1379_v13 = vmax.f32 %v1301_v11, 0.0  ;;  %v1971_v14 = vpop.f32.mrb[22].mxu1  ;;  %2025 = vmatprep.subr.bf16.mxu1 %v2024_v10 }
 0x235   : > { %v1316_v16 = vadd.f32 %v1971_v14, %v2532_v63  ;;  %v1310_v17 = vpop.f32.mrb[23].mxu1 }
 0x236   : > { %v2028_v18 = vpack.c.bf16 %v1380_v12, %v1379_v13  ;;  %v1311_v19 = vadd.f32 %v2532_v63, %v1310_v17 }
 0x237   : > { %v1382_v20 = vmax.f32 %v1316_v16, 0.0 }
 0x238   : > { %v1381_v21 = vmax.f32 %v1311_v19, 0.0  ;;  %v1974_v23 = vpop.f32.mrb[24].mxu1 }
 0x239   : > { %v1326_v24 = vadd.f32 %v1974_v23, %v2532_v63  ;;  %v1320_v25 = vpop.f32.mrb[25].mxu1  ;;  %2027 = vmatpush3.bf16.xpose.msra.mxu1 %v2541_v15 }
 0x23a   : > { %v2032_v8 = vpack.c.bf16 %v1382_v20, %v1381_v21  ;;  %v1321_v26 = vadd.f32 %v2532_v63, %v1320_v25  ;;  %2029 = vmatprep.subr.bf16.mxu1 %v2028_v18 }
 0x23b   : > { %v1384_v27 = vmax.f32 %v1326_v24, 0.0 }
 0x23c   : > { %v1383_v29 = vmax.f32 %v1321_v26, 0.0  ;;  %v1977_v31 = vpop.f32.mrb[26].mxu1 }
 0x23d   : > { %v1336_v32 = vadd.f32 %v1977_v31, %v2532_v63  ;;  %v1330_v33 = vpop.f32.mrb[27].mxu1 }
 0x23e   : > { %v2036_v34 = vpack.c.bf16 %v1384_v27, %v1383_v29  ;;  %v1331_v35 = vadd.f32 %v2532_v63, %v1330_v33 }
 0x23f   : > { %v1386_v36 = vmax.f32 %v1336_v32, 0.0 }
 0x240   : > { %v1385_v38 = vmax.f32 %v1331_v35, 0.0  ;;  %v1980_v39 = vpop.f32.mrb[28].mxu1 }
 0x241   : > { %v1346_v40 = vadd.f32 %v1980_v39, %v2532_v63  ;;  %v1340_v41 = vpop.f32.mrb[29].mxu1  ;;  %2031 = vmatpush3.bf16.xpose.msra.mxu1 %v2545_v22 }
 0x242   : > { %v2040_v15 = vpack.c.bf16 %v1386_v36, %v1385_v38  ;;  %v1341_v42 = vadd.f32 %v2532_v63, %v1340_v41  ;;  %2033 = vmatprep.subr.bf16.mxu1 %v2032_v8 }
 0x243   : > { %v1388_v43 = vmax.f32 %v1346_v40, 0.0 }
 0x244   : > { %v1387_v45 = vmax.f32 %v1341_v42, 0.0  ;;  %v1983_v46 = vpop.f32.mrb[30].mxu1 }
 0x245   : > { %v1356_v47 = vadd.f32 %v1983_v46, %v2532_v63  ;;  %v1350_v48 = vpop.f32.mrb[31].mxu1 }
 0x246   : > { %v2044_v49 = vpack.c.bf16 %v1388_v43, %v1387_v45  ;;  %v1351_v50 = vadd.f32 %v2532_v63, %v1350_v48  ;;  %v2188_v63 = vmov 1966171168  }
 0x247   : > { %v1390_v52 = vmax.f32 %v1356_v47, 0.0  ;;  %v1467_v22 = vunpack.c.l.s4 %v2188_v63 }
 0x248   : > { %v1389_v53 = vmax.f32 %v1351_v50, 0.0 }
 0x249   : > { %2035 = vmatpush3.bf16.xpose.msra.mxu1 %v2549_v30  ;;  %v1468_v30 = vunpack.c.0.s8 %v1467_v22 }
 0x24a   : > { %v2048_v54 = vpack.c.bf16 %v1390_v52, %v1389_v53  ;;  %2037 = vmatprep.subr.bf16.mxu1 %v2036_v34 }
 0x24b   : > { %v1471_v57 = vsub.s32 %v1468_v30, %v1470_v56 }
 0x251   : > { %2039 = vmatpush3.bf16.xpose.msra.mxu1 %v2553_v37 }
 0x252   : > { %2041 = vmatprep.subr.bf16.mxu1 %v2040_v15 }
 0x259   : > { %2043 = vmatpush3.bf16.xpose.msra.mxu1 %v2557_v44 }
 0x25a   : > { %2045 = vmatprep.subr.bf16.mxu1 %v2044_v49 }
 0x261   : > { %2047 = vmatpush3.bf16.xpose.msra.mxu1 %v2561_v51 }
 0x262   : > { %2049 = vmatprep.subr.bf16.mxu1 %v2048_v54 }
 0x269   : > { %2051 = vmatpush3.bf16.xpose.msra.mxu1 %v2565_v58 }
 0x270   : > { %1801 = vmatmul.mubr.f32.vlgmr.msra.gmra.mrb[32].mxu1 %v2526_v62 }
 0x343   : > { %v1458_v37 = vpop.f32.mrb[32].mxu1 }
 0x344   : > { %v1460_v44 = vpop.f32.mrb[33].mxu1 }
 0x345   : > { %v1465_v59 = vcombine.low %v1458_v37, %v1460_v44 }
 0x347   : > { %v1472_v51 = vrot.slane %v1465_v59, %v1471_v57 }
 0x349   : > { %v1479_v58 = vrot.slane %v1472_v51, %v1471_v57 }
 0x34b   : > { %1485 = vst.msk [vmem:[%s315_s10] sm:$0x3] %vm1483_vm2, %v1479_v58 }
 0x34c   : > { %2137 = shalt.err (!%p2134_p3)
}
 0x34d   : > { %s2138_s19 = scalar_lea.hbm %s2596_s12, 32  ;;  %s2142_s9 = scalar_lea.hbm %s2646_s8, 64 }
 0x34e   : > { %p2139_p4 = scmp.ne.s32.totalorder %s2596_s12, %s2138_s19  ;;  %p2143_p9 = scmp.lt.u32.totalorder %s2596_s12, %s2646_s8 }
 0x34f   : > { %p2144_p10 = scmp.lt.u32.totalorder %s2142_s9, %s2138_s19  ;;  %p2146_p12 = scmp.lt.u32.totalorder %s2138_s19, %s2596_s12 }
 0x350   : > { %p2140_p7 = pnand %p2139_p4, %p2270_p5 }
 0x351   : > { %p2145_p11 = por %p2144_p10, %p2143_p9 }
 0x352   : > { %p2141_p8 = pneg %p2140_p7 }
 0x353   : > { %p2147_p13 = por %p2146_p12, %p2145_p11 }
 0x355   : > { %p2148_p0 = pnand %p2147_p13, %p2141_p8 }
 0x357   : > { %2151 = shalt.err (!%p2148_p0)
}
 0x358   : > { %2084 = dma.vmem_to_hbm [thread:$0]  (%p2270_p5), %s2598_s24, 32, %s2596_s12, %s1487_s13  }
 0x359 PF: > { %p2090_p1 = scmp.ge.s32.totalorder %s2186_s30, 2  ;;  %s1513_s21 = sand.u32 1, %s2174_s27  }
 0x35a   : > { %s1514_s17 = scalar_lea.sflag [#allocation3], %s1513_s21 }
 0x35b   : > { %p2087_p2 = pnand %p2090_p1, %p2274_p6 }
 0x35d   : > { %2169 = dma.done.wait (!%p2087_p2), %s1514_s17, 32  }
 0x35e   : > { %2171 = vsyncadd (!%p2087_p2), %s1514_s17, 4294967264  ;;  %p18_p3 = scmp.ge.s32.totalorder %s2258_s11, 4   ;;  %s2649_s27 = smov %s2178_s28 }
 0x35f   : > { %s2650_s28 = smov %s2182_s29  ;;  %s2651_s29 = smov %s2268_s14 }
 0x360   : > { %s2652_s30 = smov %s2258_s11  ;;  %20 = sbr.rel (!%p18_p3) target bundleno = 3 (0x3), region = 90 }
 0x367   :  { %1519 = vsyncpa [#allocation3], 1 }
 0x368   :  { %1521 = vsyncpa [#allocation3 + $0x1], 1 }

</bundles_post_ra>
